<compile_context>
chip_gen: v6e
topology: v6e:2x2x1
jax: 0.10.0
libtpu: 0.0.40
codegen_flags: <defaults>
</compile_context>

<pallas_src>
import numpy as np
import jax
import jax.numpy as jnp
from jax.experimental import pallas as pl
from jax.experimental.pallas import tpu as pltpu


def _round_up(x, m):
    return ((x + m - 1) // m) * m


def _cdiv(a, b):
    return (a + b - 1) // b


# ---------------------------------------------------------------------------
# Kernels
# ---------------------------------------------------------------------------
def _mm_bias_kernel_f32out(x_ref, w_ref, b_ref, o_ref):
    """Accumulate directly into the (K-resident) f32 output block."""
    k = pl.program_id(2)

    @pl.when(k == 0)
    def _init():
        # Bias added exactly once, as the accumulator's initial value.
        o_ref[...] = jnp.broadcast_to(b_ref[...], o_ref.shape)

    o_ref[...] += jnp.dot(x_ref[...], w_ref[...],
                          preferred_element_type=jnp.float32)


def _mm_bias_kernel_acc(x_ref, w_ref, b_ref, o_ref, acc_ref):
    """f32 scratch accumulator; only used when the output dtype is not f32."""
    k = pl.program_id(2)

    @pl.when(k == 0)
    def _init():
        acc_ref[...] = jnp.broadcast_to(b_ref[...], acc_ref.shape)

    acc_ref[...] += jnp.dot(x_ref[...], w_ref[...],
                            preferred_element_type=jnp.float32)

    @pl.when(k == pl.num_programs(2) - 1)
    def _finalize():
        o_ref[...] = acc_ref[...].astype(o_ref.dtype)


# ---------------------------------------------------------------------------
# Wrapper
# ---------------------------------------------------------------------------
def _vmem_capacity_bytes():
    try:
        return int(pltpu.get_tpu_info().vmem_capacity_bytes)
    except Exception:
        return 64 << 20  # conservative fallback (v7x per-core VMEM)


def _choose_tile(dim, user, base, align):
    if user is not None:
        t = min(int(user), dim)
        if t < dim:
            t = min(_round_up(t, align), _round_up(dim, align))
        return max(t, 1)
    # auto: full-dim block for small dims (legal, never needs padding),
    # otherwise the generation-aware baseline.
    return dim if dim <= base else base


def quaternion_linear(x, weight, bias, *, tm=None, tn=None, tk=None,
                      compute_dtype=None, weight_buffers=None):
    """y = x @ weight + bias  (matches QuaternionLinear.forward).

    compute_dtype: dtype fed to the MXU (accumulation always f32).  Defaults to
      x.dtype (exact f32 semantics); pass jnp.bfloat16 on v5e/v6e/v7x for ~2x
      MXU rate and half the x/weight DMA bytes.  If the weight is reused across
      calls, cast/pad it once outside this wrapper instead of per call.
    weight_buffers: optional pipeline depth (e.g. 3) for the weight tiles if a
      profile shows exposed weight DMA on long-K problems.
    """
    M, K = x.shape
    K2, N = weight.shape
    assert K == K2, "input_dim mismatch"
    assert bias.shape == (N,), "bias shape mismatch"

    out_dtype = x.dtype
    compute_dtype = np.dtype(x.dtype if compute_dtype is None else compute_dtype)
    in_bytes = compute_dtype.itemsize
    out_bytes = np.dtype(out_dtype).itemsize
    sublane = 8 if in_bytes == 4 else 16

    # ---- generation-aware tile baselines ---------------------------------
    vmem_bytes = _vmem_capacity_bytes()
    big_vmem = vmem_bytes >= (100 << 20)           # v5e / v6e: 128 MiB VMEM
    if big_vmem:
        tm0, tn0, tk0 = 512, 1024, 1024
        vmem_cap = 80 << 20
    else:                                          # v7x (64 MiB) or unknown
        tm0, tn0, tk0 = 512, 512, 1024
        vmem_cap = 40 << 20

    auto_mn = (tm is None) and (tn is None)
    tm = _choose_tile(M, tm, tm0, sublane)
    tn = _choose_tile(N, tn, tn0, 128)
    tk = _choose_tile(K, tk, tk0, 128)

    # ---- make sure both v7x TensorCores get parallel (M, N) work ----------
    if auto_mn and not big_vmem:
        while _cdiv(M, tm) * _cdiv(N, tn) < 2:
            if tm % (2 * sublane) == 0 and M % (tm // 2) == 0:
                tm //= 2
            elif tn % 256 == 0 and N % (tn // 2) == 0:
                tn //= 2
            else:
                break

    grid_m, grid_n, grid_k = _cdiv(M, tm), _cdiv(N, tn), _cdiv(K, tk)
    Mp, Np, Kp = grid_m * tm, grid_n * tn, grid_k * tk

    # ---- pad / cast only what actually needs it ---------------------------
    def _prep(a, padded_shape, dtype):
        if a.shape == tuple(padded_shape):
            return a if a.dtype == dtype else a.astype(dtype)
        out = jnp.zeros(padded_shape, dtype)
        idx = tuple(slice(0, s) for s in a.shape)
        return out.at[idx].set(a.astype(dtype))

    xp = _prep(x, (Mp, Kp), compute_dtype)
    wp = _prep(weight, (Kp, Np), compute_dtype)
    bp = _prep(bias.reshape(1, N), (1, Np), jnp.float32)

    use_scratch = np.dtype(out_dtype) != np.dtype(jnp.float32)
    kernel = _mm_bias_kernel_acc if use_scratch else _mm_bias_kernel_f32out
    scratch = [pltpu.VMEM((tm, tn), jnp.float32)] if use_scratch else []

    # ---- VMEM budget & scheduler cost hint --------------------------------
    nbuf_w = int(weight_buffers) if weight_buffers else 2
    working = (2 * tm * tk * in_bytes            # x tiles (double buffered)
               + nbuf_w * tk * tn * in_bytes     # weight tiles
               + 2 * tn * 4                      # bias row
               + 2 * tm * tn * out_bytes         # output tiles
               + (tm * tn * 4 if use_scratch else 0))
    vmem_limit = int(min(max(working * 3 // 2, 32 << 20), vmem_cap))

    cost = pl.CostEstimate(
        flops=2 * Mp * Kp * Np,
        transcendentals=0,
        # x is re-read grid_n times, weight grid_m times.
        bytes_accessed=(in_bytes * (Mp * Kp * grid_n + Kp * Np * grid_m)
                        + 4 * Np * grid_m + out_bytes * Mp * Np),
    )

    w_spec_kwargs = {}
    if weight_buffers is not None and int(weight_buffers) != 2:
        w_spec_kwargs["pipeline_mode"] = pl.Buffered(int(weight_buffers))

    out_padded = pl.pallas_call(
        kernel,
        out_shape=jax.ShapeDtypeStruct((Mp, Np), out_dtype),
        grid_spec=pltpu.PrefetchScalarGridSpec(
            num_scalar_prefetch=0,
            grid=(grid_m, grid_n, grid_k),
            in_specs=[
                pl.BlockSpec((tm, tk), lambda i, j, k: (i, k)),                 # x
                pl.BlockSpec((tk, tn), lambda i, j, k: (k, j), **w_spec_kwargs),  # weight
                pl.BlockSpec((1, tn), lambda i, j, k: (0, j)),                  # bias
            ],
            out_specs=pl.BlockSpec((tm, tn), lambda i, j, k: (i, j)),
            scratch_shapes=scratch,
        ),
        compiler_params=pltpu.CompilerParams(
            dimension_semantics=("parallel", "parallel", "arbitrary"),
            vmem_limit_bytes=vmem_limit,
        ),
        cost_estimate=cost,
    )(xp, wp, bp)

    if (Mp, Np) != (M, N):
        out_padded = out_padded[:M, :N]
    return out_padded


if __name__ == "__main__":
    key = jax.random.PRNGKey(0)
    keys = jax.random.split(key, 9)
    (k_x, k_w, k_b, k_x2, k_w2, k_b2, k_x3, k_w3, k_b3) = keys

    # --- small shapes matching the module (batch=8, input_dim=32, output_dim=64)
    batch, input_dim, output_dim = 8, 32, 64
    x = jax.random.normal(k_x, (batch, input_dim), dtype=jnp.float32)
    w = jax.random.normal(k_w, (input_dim, output_dim), dtype=jnp.float32)
    b = jax.random.normal(k_b, (output_dim,), dtype=jnp.float32)

    y = jax.block_until_ready(quaternion_linear(x, w, b))
    y_ref = x @ w + b
    assert y.shape == (batch, output_dim)
    assert jnp.allclose(y, y_ref, atol=1e-5, rtol=1e-5), "f32 mismatch (small)"

    # --- aligned multi-tile grid: no-padding path, K accumulation, parallel M/N
    x2 = jax.random.normal(k_x2, (256, 384), dtype=jnp.float32)
    w2 = jax.random.normal(k_w2, (384, 512), dtype=jnp.float32)
    b2 = jax.random.normal(k_b2, (512,), dtype=jnp.float32)
    y2 = jax.block_until_ready(quaternion_linear(x2, w2, b2, tm=128, tn=256, tk=128))
    y2_ref = jnp.dot(x2, w2, precision=jax.lax.Precision.HIGHEST) + b2
    assert jnp.allclose(y2, y2_ref, atol=5e-3, rtol=5e-4), "f32 mismatch (tiled)"

    # --- misaligned shapes: pad only the dims that need it
    x3 = jax.random.normal(k_x3, (20, 130), dtype=jnp.float32)
    w3 = jax.random.normal(k_w3, (130, 200), dtype=jnp.float32)
    b3 = jax.random.normal(k_b3, (200,), dtype=jnp.float32)
    y3 = jax.block_until_ready(quaternion_linear(x3, w3, b3, tn=128, tk=128))
    y3_ref = jnp.dot(x3, w3, precision=jax.lax.Precision.HIGHEST) + b3
    assert jnp.allclose(y3, y3_ref, atol=5e-3, rtol=5e-4), "f32 mismatch (padded)"

    # --- bf16-compute opt-in (f32 accumulation), looser tolerance
    y_bf16 = jax.block_until_ready(
        quaternion_linear(x, w, b, compute_dtype=jnp.bfloat16))
    assert jnp.allclose(y_bf16, y_ref, atol=0.25, rtol=0.05), "bf16 mismatch"

    print("KERNEL_OK")
</pallas_src>

<mosaic_0001>
module attributes {stable_mosaic.version = 11 : i64} {
  func.func @_mm_bias_kernel_f32out(%arg0: i32, %arg1: i32, %arg2: i32, %arg3: memref<8x32xf32, #tpu.memory_space<vmem>>, %arg4: memref<32x64xf32, #tpu.memory_space<vmem>>, %arg5: memref<1x64xf32, #tpu.memory_space<vmem>>, %arg6: memref<8x64xf32, #tpu.memory_space<vmem>>) attributes {dimension_semantics = [#tpu.dimension_semantics<parallel>, #tpu.dimension_semantics<parallel>, #tpu.dimension_semantics<arbitrary>], iteration_bounds = array<i64: 1, 1, 1>, scalar_prefetch = 0 : i64, scratch_operands = 0 : i64, tpu.core_type = #tpu.core_type<tc>, window_params = [{transform_indices = @transform_0, window_bounds = array<i64: 8, 32>}, {transform_indices = @transform_1, window_bounds = array<i64: 32, 64>}, {transform_indices = @transform_2, window_bounds = array<i64: 1, 64>}, {transform_indices = @transform_3, window_bounds = array<i64: 8, 64>}]} {
    %c0_i32 = arith.constant 0 : i32
    %0 = arith.cmpi eq, %arg2, %c0_i32 : i32
    %1 = arith.extui %0 : i1 to i32
    %c0_i32_0 = arith.constant 0 : i32
    %2 = arith.cmpi ne, %1, %c0_i32_0 : i32
    scf.if %2 {
      %c0_8 = arith.constant 0 : index
      %c0_9 = arith.constant 0 : index
      %9 = vector.load %arg5[%c0_8, %c0_9] : memref<1x64xf32, #tpu.memory_space<vmem>>, vector<1x64xf32>
      %10 = vector.shape_cast %9 : vector<1x64xf32> to vector<1x64xf32>
      %11 = vector.broadcast %10 : vector<1x64xf32> to vector<8x64xf32>
      %c0_10 = arith.constant 0 : index
      %c0_11 = arith.constant 0 : index
      %12 = vector.load %arg6[%c0_10, %c0_11] : memref<8x64xf32, #tpu.memory_space<vmem>>, vector<8x64xf32>
      tpu.vector_store %arg6[%c0_10, %c0_11], %11 {strides = array<i32>} : memref<8x64xf32, #tpu.memory_space<vmem>>, vector<8x64xf32>,
    } else {
    }
    %c0 = arith.constant 0 : index
    %c0_1 = arith.constant 0 : index
    %3 = vector.load %arg6[%c0, %c0_1] : memref<8x64xf32, #tpu.memory_space<vmem>>, vector<8x64xf32>
    %c0_2 = arith.constant 0 : index
    %c0_3 = arith.constant 0 : index
    %4 = vector.load %arg3[%c0_2, %c0_3] : memref<8x32xf32, #tpu.memory_space<vmem>>, vector<8x32xf32>
    %c0_4 = arith.constant 0 : index
    %c0_5 = arith.constant 0 : index
    %5 = vector.load %arg4[%c0_4, %c0_5] : memref<32x64xf32, #tpu.memory_space<vmem>>, vector<32x64xf32>
    %cst = arith.constant dense<0.000000e+00> : vector<8x64xf32>
    %6 = tpu.matmul %4, %5, %cst {dimension_numbers = #tpu.dot_dimension_numbers<[1], [0], [0], [1], [0, 0, 1, 1], [], []>} : vector<8x32xf32>, vector<32x64xf32>, vector<8x64xf32> -> vector<8x64xf32>
    %7 = arith.addf %3, %6 : vector<8x64xf32>
    %c0_6 = arith.constant 0 : index
    %c0_7 = arith.constant 0 : index
    %8 = vector.load %arg6[%c0_6, %c0_7] : memref<8x64xf32, #tpu.memory_space<vmem>>, vector<8x64xf32>
    tpu.vector_store %arg6[%c0_6, %c0_7], %7 {strides = array<i32>} : memref<8x64xf32, #tpu.memory_space<vmem>>, vector<8x64xf32>,
    return
  }
  func.func @transform_0(%arg0: i32, %arg1: i32, %arg2: i32) -> (i32, i32) {
    %c0_i32 = arith.constant 0 : i32
    return %arg0, %arg2 : i32, i32
  }
  func.func @transform_1(%arg0: i32, %arg1: i32, %arg2: i32) -> (i32, i32) {
    %c0_i32 = arith.constant 0 : i32
    return %arg2, %arg1 : i32, i32
  }
  func.func @transform_2(%arg0: i32, %arg1: i32, %arg2: i32) -> (i32, i32) {
    %c0_i32 = arith.constant 0 : i32
    %c0_i32_0 = arith.constant 0 : i32
    return %c0_i32, %arg1 : i32, i32
  }
  func.func @transform_3(%arg0: i32, %arg1: i32, %arg2: i32) -> (i32, i32) {
    %c0_i32 = arith.constant 0 : i32
    return %arg0, %arg1 : i32, i32
  }
}

</mosaic_0001>

<bundles_post_ra>
// kernel: tpu_custom_call.1
= control target key start
LH: loop header
LB: loop body
LE: loop exit
PB: predicated region body
PF: predicated region fallthrough
CT: control target
= control target key end

     0   :  { %8 = vsyncpa [#allocation3], 0  ;;  %s285_s0 = inlined_call_operand.hbm [shape: f32[8,32], index: 0, kind: input, shape index: {}]   ;;  %s286_s1 = inlined_call_operand.hbm [shape: f32[32,64], index: 1, kind: input, shape index: {}]   ;;  %s287_s2 = inlined_call_operand.vmem [shape: f32[1,64], index: 2, kind: input, shape index: {}]   ;;  %s288_s3 = inlined_call_operand.hbm [shape: f32[8,64], index: 3, kind: output, shape index: {}]  }
   0x1   :  { %9 = vsyncpa [#allocation6], 0 }
   0x2   :  { %10 = vsyncpa [#allocation4], 0  ;;  %s244_s12 = smov [#allocation2]   ;;  %s245_s14 = smov [#allocation5]  }
   0x3   :  { %s17_s13 = sshll.u32 %s244_s12, 4  ;;  %s26_s15 = sshll.u32 %s245_s14, 4  ;;  %s18_s13 = int_to_ptr.vmem [resolvable:$true] %s17_s13  ;;  %s27_s15 = int_to_ptr.vmem [resolvable:$true] %s26_s15 }
   0x4   :  { %s186_s16 = scalar_lea.vmem %s18_s13, 128  ;;  %p191_p1 = scmp.lt.s32.totalorder %s18_s13, %s18_s13 }
   0x5   :  { %p187_p0 = scmp.ne.s32.totalorder %s18_s13, %s186_s16  ;;  %p192_p2 = scmp.lt.s32.totalorder %s186_s16, %s186_s16 }
   0x7   :  { %p193_p3 = por %p192_p2, %p191_p1 }
   0x9   :  { %p194_p4 = pnand %p193_p3, %p187_p0 }
   0xb   :  { %197 = shalt.err (!%p194_p4)
}
   0xc   :  { %20 = dma.hbm_to_vmem [thread:$0]  %s285_s0, 128, %s18_s13, [#allocation3]  }
   0xd   :  { %s206_s19 = scalar_lea.vmem %s27_s15, 512  ;;  %p211_p6 = scmp.lt.s32.totalorder %s27_s15, %s27_s15 }
   0xe   :  { %p207_p5 = scmp.ne.s32.totalorder %s27_s15, %s206_s19  ;;  %p212_p7 = scmp.lt.s32.totalorder %s206_s19, %s206_s19 }
  0x10   :  { %p213_p8 = por %p212_p7, %p211_p6 }
  0x12   :  { %p214_p9 = pnand %p213_p8, %p207_p5 }
  0x14   :  { %217 = shalt.err (!%p214_p9)
}
  0x15   :  { %s246_s20 = smov 128   ;;  %s247_s21 = smov 8  }
  0x16   :  { %32 = dma.hbm_to_vmem [thread:$0]  %s286_s1, 512, %s27_s15, [#allocation6], %s246_s20, %s246_s20, %s247_s21  }
  0x17   :  { %238 = dma.done.wait [#allocation3], 128  }
  0x18   :  { %239 = vsyncadd [#allocation3], 4294967168 }
  0x19   :  { %240 = dma.done.wait [#allocation6], 512  }
  0x1a   :  { %241 = vsyncadd [#allocation6], 4294966784  ;;  %v248_v0 = vmov 0.0   ;;  %vm249_vm0 = vmmov 0   ;;  %vm52_vm1 = vcmask 523264   ;;  %v59_v2 = vld [vmem:[#allocation5 + $0x18] sm:$0xff] }
  0x1b   :  { %160 = vmatprep.subr.mxu0 %v248_v0  ;;  %168 = vmatprep.mubr.msk.f32.mxu0 %vm249_vm0, %v248_v0  ;;  %v153_v1 = vld [vmem:[%s287_s2] ss:$0 sm:$0xff]  ;;  %v58_v3 = vld [vmem:[#allocation5 + $0x10] sm:$0xff]  ;;  %v57_v4 = vld [vmem:[#allocation5 + $0x8] sm:$0xff]  ;;  %vm60_vm2 = vcmask 261120   ;;  %s250_s1 = smov [#allocation7]  }
  0x1c   :  { %53 = vst.msk [vmem:[#allocation7] sm:$0xff] %vm52_vm1, %v153_v1  ;;  %161 = vmatpush3.msra.mxu0 %v59_v2  ;;  %v56_v5 = vld [vmem:[#allocation5] sm:$0xff]  ;;  %v55_v6 = vld [vmem:[#allocation2] sm:$0xff]  ;;  %s143_s25 = sshll.u32 %s250_s1, 4  ;;  %s144_s25 = int_to_ptr.vmem [resolvable:$true] %s143_s25 }
  0x1d   :  { %162 = vmatprep.subr.mxu0 %v248_v0  ;;  %s218_s2 = scalar_lea.vmem %s144_s25, 128  ;;  %p223_p11 = scmp.lt.s32.totalorder %s144_s25, %s144_s25 }
  0x1e   :  { %163 = vmatpush3.msra.mxu0 %v58_v3  ;;  %p219_p10 = scmp.ne.s32.totalorder %s144_s25, %s218_s2  ;;  %p224_p12 = scmp.lt.s32.totalorder %s218_s2, %s218_s2 }
  0x1f   :  { %164 = vmatprep.subr.mxu0 %v248_v0 }
  0x20   :  { %165 = vmatpush3.msra.mxu0 %v57_v4  ;;  %p225_p13 = por %p224_p12, %p223_p11 }
  0x21   :  { %166 = vmatprep.subr.mxu0 %v248_v0 }
  0x22   :  { %167 = vmatpush3.msra.mxu0 %v56_v5  ;;  %p226_p0 = pnand %p225_p13, %p219_p10 }
  0x23   :  { %169 = vmatmul.mubr.msk.f32.vlgmr.msra.gmra.mxu0 %vm60_vm2, %v55_v6  ;;  %v54_v7 = vld [vmem:[#allocation7] sm:$0xff] }
  0xe3   :  { %v130_v8 = vpop.f32.mrf.mxu0 }
  0xe4   :  { %v134_v9 = vadd.f32 %v130_v8, %v54_v7 }
  0xe5   :  { %v170_v10 = vpop.f32.mrf.mxu0 }
  0xe6   :  { %136 = vst.msk [vmem:[#allocation7] sm:$0xff] %vm52_vm1, %v134_v9 }
  0xe7   :  { %229 = shalt.err (!%p226_p0)
}
  0xe8   :  { %146 = dma.vmem_to_hbm [thread:$0]  %s144_s25, 128, %s288_s3, [#allocation4]  }
  0xe9   :  { %242 = dma.done.wait [#allocation4], 128  }
  0xea   :  { %243 = vsyncadd [#allocation4], 4294967168 }
  0xeb   :  { %150 = vsyncpa [#allocation3], 1 }
  0xec   :  { %151 = vsyncpa [#allocation6], 1 }
  0xed   :  { %152 = vsyncpa [#allocation4], 1 }

</bundles_post_ra>
